<compile_context>
chip_gen: v6e
topology: v6e:2x2x1
jax: 0.10.0
libtpu: 0.0.40
codegen_flags: <defaults>
</compile_context>

<pallas_src>
import functools
import math

import jax
import jax.numpy as jnp
from jax.experimental import pallas as pl
from jax.experimental.pallas import tpu as pltpu


def _gaussian_1d(k, sigma):
    """1-D factor of the PyTorch buffer exp(-(x^2+y^2)/2/sigma^2) (NOT normalized)."""
    half = k // 2
    return tuple(math.exp(-float(d - half) ** 2 / 2.0 / float(sigma) ** 2) for d in range(k))


def _gaussian_kernel_weights(kernel_size=(3, 3), sigma=1.0):
    """2-D buffer, used only by the pure-JAX reference."""
    kh, kw = kernel_size
    y = jnp.arange(-(kh // 2), kh // 2 + 1, dtype=jnp.float32)
    x = jnp.arange(-(kw // 2), kw // 2 + 1, dtype=jnp.float32)
    return jnp.exp(-(x[None, :] ** 2 + y[:, None] ** 2) / 2.0 / float(sigma) ** 2)


def _blur_kernel(x_ref, o_ref, xp_ref, *, wy, wx, H, W, ph, pw):
    # x_ref : (Cb, H, W)              input tile (channels on the major axis)
    # o_ref : (Cb, H, W)              output tile
    # xp_ref: (Cb, H+2*ph, W+2*pw)    f32 scratch holding the zero halo
    Cb = xp_ref.shape[0]
    Hp = H + 2 * ph
    Wp = W + 2 * pw

    # Re-zero only the halo border every grid step (tiny), so the scratch carries
    # no state across iterations -> safe under "parallel" / megacore sharding.
    if ph > 0:
        xp_ref[:, 0:ph, :] = jnp.zeros((Cb, ph, Wp), jnp.float32)
        xp_ref[:, ph + H:Hp, :] = jnp.zeros((Cb, ph, Wp), jnp.float32)
    if pw > 0:
        xp_ref[:, :, 0:pw] = jnp.zeros((Cb, Hp, pw), jnp.float32)
        xp_ref[:, :, pw + W:Wp] = jnp.zeros((Cb, Hp, pw), jnp.float32)

    xp_ref[:, ph:ph + H, pw:pw + W] = x_ref[...].astype(jnp.float32)

    # Separable Gaussian: 1-D pass along W (lane axis), then along H (sublane axis).
    tmp = wx[0] * xp_ref[:, :, 0:W]
    for dx in range(1, 2 * pw + 1):
        tmp = tmp + wx[dx] * xp_ref[:, :, dx:dx + W]          # (Cb, H+2*ph, W)

    acc = wy[0] * tmp[:, 0:H, :]
    for dy in range(1, 2 * ph + 1):
        acc = acc + wy[dy] * tmp[:, dy:dy + H, :]             # (Cb, H, W)

    o_ref[...] = acc.astype(o_ref.dtype)


def _per_core_vmem_bytes():
    """Per-TensorCore VMEM, conservatively capped at 64 MiB (v7x per-TC size)."""
    cap = 64 * 1024 * 1024
    try:
        cap = min(cap, int(pltpu.get_tpu_info().vmem_capacity_bytes))
    except Exception:
        pass
    return cap


def _pick_channel_block(NC, per_chan_bytes):
    """Channel-block size: fits the per-core VMEM budget, never forced above it."""
    budget = _per_core_vmem_bytes() // 2          # headroom below the per-core cap
    cb = max(1, budget // per_chan_bytes)         # clamp to budget (no forced 128)
    if NC >= 2:
        # Keep >= 2 grid steps so double-buffering overlaps DMA with compute and
        # both v7x TensorCores get work.
        cb = min(cb, pl.cdiv(NC, 2))
    return int(min(cb, NC))


def gaussian_blur(x, kernel_size=(3, 3), sigma=1.0):
    """x: (N, C, H, W). Returns F.conv2d(x, gaussian_kernel, padding='same', groups=C)."""
    if isinstance(kernel_size, int):
        kernel_size = (kernel_size, kernel_size)
    kernel_size = tuple(kernel_size)
    if kernel_size == (1, 1):
        return x
    kh, kw = kernel_size
    assert kh % 2 == 1 and kw % 2 == 1
    N, C, H, W = x.shape
    ph, pw = kh // 2, kw // 2
    NC = N * C

    # Constant per-module buffer, baked in as Python floats (separable factors).
    wy = _gaussian_1d(kh, sigma)
    wx = _gaussian_1d(kw, sigma)

    # Free layout change (no data movement): channels fold into the major axis,
    # W stays on the lane axis.
    x3 = x.reshape(NC, H, W)

    itemsize = jnp.dtype(x.dtype).itemsize
    # Per-channel VMEM: double-buffered in/out blocks + f32 halo scratch + the
    # live f32 intermediates (tmp of the W-pass and the accumulator).
    per_chan = (4 * H * W * itemsize                     # in + out, double-buffered
                + (H + 2 * ph) * (W + 2 * pw) * 4        # halo scratch
                + (H + 2 * ph) * W * 4                   # tmp (W-pass result)
                + H * W * 4)                             # acc
    cb = _pick_channel_block(NC, per_chan)
    grid = (pl.cdiv(NC, cb),)

    per_core = _per_core_vmem_bytes()
    needed = cb * per_chan + (4 << 20)                   # + compiler-internal headroom
    vmem_limit = int(min(per_core - (2 << 20), max(needed, 32 << 20)))

    kernel = functools.partial(_blur_kernel, wy=wy, wx=wx, H=H, W=W, ph=ph, pw=pw)

    out3 = pl.pallas_call(
        kernel,
        out_shape=jax.ShapeDtypeStruct((NC, H, W), x.dtype),
        grid_spec=pltpu.PrefetchScalarGridSpec(
            num_scalar_prefetch=0,
            grid=grid,
            in_specs=[pl.BlockSpec((cb, H, W), lambda i: (i, 0, 0))],
            out_specs=pl.BlockSpec((cb, H, W), lambda i: (i, 0, 0)),
            scratch_shapes=[pltpu.VMEM((cb, H + 2 * ph, W + 2 * pw), jnp.float32)],
        ),
        compiler_params=pltpu.CompilerParams(
            dimension_semantics=("parallel",),
            vmem_limit_bytes=vmem_limit,
        ),
    )(x3)

    return out3.reshape(N, C, H, W)


def gaussian_blur_ref(x, kernel_size=(3, 3), sigma=1.0):
    """Pure-JAX reference (matches F.conv2d with groups=C and the unnormalized buffer)."""
    if tuple(kernel_size) == (1, 1):
        return x
    N, C, H, W = x.shape
    kh, kw = kernel_size
    w = _gaussian_kernel_weights(kernel_size, sigma)
    kern = jnp.broadcast_to(w[None, None], (C, 1, kh, kw))
    return jax.lax.conv_general_dilated(
        x, kern,
        window_strides=(1, 1),
        padding=((kh // 2, kh // 2), (kw // 2, kw // 2)),
        dimension_numbers=("NCHW", "OIHW", "NCHW"),
        feature_group_count=C,
    )


if __name__ == "__main__":
    key = jax.random.PRNGKey(0)
    N, C, H, W = 2, 4, 16, 16
    x = jax.random.normal(key, (N, C, H, W), dtype=jnp.float32)

    out = gaussian_blur(x, kernel_size=(3, 3), sigma=1.0)
    out = jax.block_until_ready(out)

    ref = gaussian_blur_ref(x, kernel_size=(3, 3), sigma=1.0)
    assert out.shape == (N, C, H, W)
    assert jnp.allclose(out, ref, atol=1e-5, rtol=1e-5), float(jnp.max(jnp.abs(out - ref)))

    print("KERNEL_OK")
</pallas_src>

<mosaic_0001>
module attributes {stable_mosaic.version = 11 : i64} {
  func.func @_blur_kernel(%arg0: i32, %arg1: memref<4x16x16xf32, #tpu.memory_space<vmem>>, %arg2: memref<4x16x16xf32, #tpu.memory_space<vmem>>, %arg3: memref<4x18x18xf32, #tpu.memory_space<vmem>>) attributes {dimension_semantics = [#tpu.dimension_semantics<parallel>], iteration_bounds = array<i64: 2>, scalar_prefetch = 0 : i64, scratch_operands = 1 : i64, tpu.core_type = #tpu.core_type<tc>, window_params = [{transform_indices = @transform_0, window_bounds = array<i64: 4, 16, 16>}, {transform_indices = @transform_1, window_bounds = array<i64: 4, 16, 16>}]} {
    %cst = arith.constant 0.000000e+00 : f32
    %0 = vector.broadcast %cst : f32 to vector<4x1x18xf32>
    %c0 = arith.constant 0 : index
    %c0_0 = arith.constant 0 : index
    %c0_1 = arith.constant 0 : index
    %1 = vector.load %arg3[%c0, %c0_0, %c0_1] : memref<4x18x18xf32, #tpu.memory_space<vmem>>, vector<4x1x18xf32>
    tpu.vector_store %arg3[%c0, %c0_0, %c0_1], %0 {strides = array<i32>} : memref<4x18x18xf32, #tpu.memory_space<vmem>>, vector<4x1x18xf32>,
    %cst_2 = arith.constant 0.000000e+00 : f32
    %2 = vector.broadcast %cst_2 : f32 to vector<4x1x18xf32>
    %c0_3 = arith.constant 0 : index
    %c17 = arith.constant 17 : index
    %c0_4 = arith.constant 0 : index
    %3 = vector.load %arg3[%c0_3, %c17, %c0_4] : memref<4x18x18xf32, #tpu.memory_space<vmem>>, vector<4x1x18xf32>
    tpu.vector_store %arg3[%c0_3, %c17, %c0_4], %2 {strides = array<i32>} : memref<4x18x18xf32, #tpu.memory_space<vmem>>, vector<4x1x18xf32>,
    %cst_5 = arith.constant 0.000000e+00 : f32
    %4 = vector.broadcast %cst_5 : f32 to vector<4x18x1xf32>
    %c0_6 = arith.constant 0 : index
    %c0_7 = arith.constant 0 : index
    %c0_8 = arith.constant 0 : index
    %5 = vector.load %arg3[%c0_6, %c0_7, %c0_8] : memref<4x18x18xf32, #tpu.memory_space<vmem>>, vector<4x18x1xf32>
    tpu.vector_store %arg3[%c0_6, %c0_7, %c0_8], %4 {strides = array<i32>} : memref<4x18x18xf32, #tpu.memory_space<vmem>>, vector<4x18x1xf32>,
    %cst_9 = arith.constant 0.000000e+00 : f32
    %6 = vector.broadcast %cst_9 : f32 to vector<4x18x1xf32>
    %c0_10 = arith.constant 0 : index
    %c0_11 = arith.constant 0 : index
    %c17_12 = arith.constant 17 : index
    %7 = vector.load %arg3[%c0_10, %c0_11, %c17_12] : memref<4x18x18xf32, #tpu.memory_space<vmem>>, vector<4x18x1xf32>
    tpu.vector_store %arg3[%c0_10, %c0_11, %c17_12], %6 {strides = array<i32>} : memref<4x18x18xf32, #tpu.memory_space<vmem>>, vector<4x18x1xf32>,
    %c0_13 = arith.constant 0 : index
    %c0_14 = arith.constant 0 : index
    %c0_15 = arith.constant 0 : index
    %8 = vector.load %arg1[%c0_13, %c0_14, %c0_15] : memref<4x16x16xf32, #tpu.memory_space<vmem>>, vector<4x16x16xf32>
    %c0_16 = arith.constant 0 : index
    %c1 = arith.constant 1 : index
    %c1_17 = arith.constant 1 : index
    %9 = vector.load %arg3[%c0_16, %c1, %c1_17] : memref<4x18x18xf32, #tpu.memory_space<vmem>>, vector<4x16x16xf32>
    tpu.vector_store %arg3[%c0_16, %c1, %c1_17], %8 {strides = array<i32>} : memref<4x18x18xf32, #tpu.memory_space<vmem>>, vector<4x16x16xf32>,
    %c0_18 = arith.constant 0 : index
    %c0_19 = arith.constant 0 : index
    %c0_20 = arith.constant 0 : index
    %10 = vector.load %arg3[%c0_18, %c0_19, %c0_20] : memref<4x18x18xf32, #tpu.memory_space<vmem>>, vector<4x18x16xf32>
    %cst_21 = arith.constant 0.606530666 : f32
    %11 = vector.broadcast %cst_21 : f32 to vector<4x18x16xf32>
    %12 = arith.mulf %11, %10 : vector<4x18x16xf32>
    %c0_22 = arith.constant 0 : index
    %c0_23 = arith.constant 0 : index
    %c1_24 = arith.constant 1 : index
    %13 = vector.load %arg3[%c0_22, %c0_23, %c1_24] : memref<4x18x18xf32, #tpu.memory_space<vmem>>, vector<4x18x16xf32>
    %cst_25 = arith.constant 1.000000e+00 : f32
    %14 = vector.broadcast %cst_25 : f32 to vector<4x18x16xf32>
    %15 = arith.mulf %14, %13 : vector<4x18x16xf32>
    %16 = arith.addf %12, %15 : vector<4x18x16xf32>
    %c0_26 = arith.constant 0 : index
    %c0_27 = arith.constant 0 : index
    %c2 = arith.constant 2 : index
    %17 = vector.load %arg3[%c0_26, %c0_27, %c2] : memref<4x18x18xf32, #tpu.memory_space<vmem>>, vector<4x18x16xf32>
    %cst_28 = arith.constant 0.606530666 : f32
    %18 = vector.broadcast %cst_28 : f32 to vector<4x18x16xf32>
    %19 = arith.mulf %18, %17 : vector<4x18x16xf32>
    %20 = arith.addf %16, %19 : vector<4x18x16xf32>
    %21 = vector.extract_strided_slice %20 {offsets = [0, 0, 0], sizes = [4, 16, 16], strides = [1, 1, 1]} : vector<4x18x16xf32> to vector<4x16x16xf32>
    %cst_29 = arith.constant 0.606530666 : f32
    %22 = vector.broadcast %cst_29 : f32 to vector<4x16x16xf32>
    %23 = arith.mulf %22, %21 : vector<4x16x16xf32>
    %24 = vector.extract_strided_slice %20 {offsets = [0, 1, 0], sizes = [4, 16, 16], strides = [1, 1, 1]} : vector<4x18x16xf32> to vector<4x16x16xf32>
    %cst_30 = arith.constant 1.000000e+00 : f32
    %25 = vector.broadcast %cst_30 : f32 to vector<4x16x16xf32>
    %26 = arith.mulf %25, %24 : vector<4x16x16xf32>
    %27 = arith.addf %23, %26 : vector<4x16x16xf32>
    %28 = vector.extract_strided_slice %20 {offsets = [0, 2, 0], sizes = [4, 16, 16], strides = [1, 1, 1]} : vector<4x18x16xf32> to vector<4x16x16xf32>
    %cst_31 = arith.constant 0.606530666 : f32
    %29 = vector.broadcast %cst_31 : f32 to vector<4x16x16xf32>
    %30 = arith.mulf %29, %28 : vector<4x16x16xf32>
    %31 = arith.addf %27, %30 : vector<4x16x16xf32>
    %c0_32 = arith.constant 0 : index
    %c0_33 = arith.constant 0 : index
    %c0_34 = arith.constant 0 : index
    %32 = vector.load %arg2[%c0_32, %c0_33, %c0_34] : memref<4x16x16xf32, #tpu.memory_space<vmem>>, vector<4x16x16xf32>
    tpu.vector_store %arg2[%c0_32, %c0_33, %c0_34], %31 {strides = array<i32>} : memref<4x16x16xf32, #tpu.memory_space<vmem>>, vector<4x16x16xf32>,
    return
  }
  func.func @transform_0(%arg0: i32) -> (i32, i32, i32) {
    %c0_i32 = arith.constant 0 : i32
    %c0_i32_0 = arith.constant 0 : i32
    %c0_i32_1 = arith.constant 0 : i32
    return %arg0, %c0_i32, %c0_i32_0 : i32, i32, i32
  }
  func.func @transform_1(%arg0: i32) -> (i32, i32, i32) {
    %c0_i32 = arith.constant 0 : i32
    %c0_i32_0 = arith.constant 0 : i32
    %c0_i32_1 = arith.constant 0 : i32
    return %arg0, %c0_i32, %c0_i32_0 : i32, i32, i32
  }
}

</mosaic_0001>

<bundles_post_ra>
// kernel: tpu_custom_call.1
= control target key start
LH: loop header
LB: loop body
LE: loop exit
PB: predicated region body
PF: predicated region fallthrough
CT: control target
= control target key end

     0   :  { %6 = vsyncpa [#allocation4], 0  ;;  %s1020_s0 = inlined_call_operand.hbm [shape: f32[8,16,16], index: 0, kind: input, shape index: {}]   ;;  %s1021_s1 = inlined_call_operand.hbm [shape: f32[8,16,16], index: 1, kind: output, shape index: {}]  }
   0x1   :  { %8 = vsyncpa [#allocation4 + $0x1], 0 }
   0x2   :  { %9 = vsyncpa [#allocation5], 0 }
   0x3   :  { %11 = vsyncpa [#allocation5 + $0x1], 0  ;;  %s763_s6 = smov 0   ;;  %s765_s7 = smov 0  }
   0x4   :  { %s767_s8 = smov 0   ;;  %s769_s9 = smov 0  }
   0x5 LB: > { %s784_s10 = sadd.s32 4294967295, %s741_s9   ;;  %s575_s11 = sadd.s32 4294967294, %s741_s9   ;;  %s741_s9 = sphi %s769_s9, %s1036_s9   ;;  %s737_s8 = sphi %s767_s8, %s1035_s8   ;;  %s733_s7 = sphi %s765_s7, %s1034_s7   ;;  %s729_s6 = sphi %s763_s6, %s1033_s6  }
   0x6   : > { %s788_s12 = sadd.s32 1, %s741_s9   ;;  %s24_s13 = sadd.s32 1, %s737_s8 }
   0x7   : > { %s21_s14 = ssub.s32 %s741_s9, %s788_s12  ;;  %p31_p0 = scmp.ne.s32.totalorder %s737_s8, %s733_s7 }
   0x8   : > { %p22_p1 = scmp.eq.s32.totalorder %s21_s14, 0  ;;  %p32_p2 = scmp.eq.s32.totalorder %s741_s9, 0 }
   0x9   : > { %p37_p3 = scmp.ne.s32.totalorder %s733_s7, %s729_s6  ;;  %p38_p4 = scmp.eq.s32.totalorder %s784_s10, 0 }
   0xa   : > { %s800_s15 = scalar_select %p22_p1, %s737_s8, %s24_s13  }
   0xb   : > { %p802_p5 = por %p32_p2, %p31_p0  ;;  %p806_p6 = por %p38_p4, %p37_p3 }
   0xc   : > { %p61_p7 = scmp.eq.s32.totalorder %s784_s10, 1  ;;  %p67_p8 = scmp.eq.s32.totalorder %s575_s11, 1 }
   0xd   : > { %s1025_s17 = scalar_select %p806_p6, 1, 0 }
   0xe   : > { %p607_p10 = scmp.lt.s32.totalorder %s741_s9, 2  ;;  %p813_p11 = por %p61_p7, %p31_p0 }
   0xf   : > { %p817_p12 = por %p67_p8, %p37_p3  ;;  %s87_s20 = sand.u32 1, %s737_s8  }
  0x10   : > { %s1026_s18 = scalar_select %p813_p11, 1, 0 }
  0x11   : > { %s1027_s19 = scalar_select %p817_p12, 1, 0 }
  0x12   : > { %s592_s21 = sshll.u32 %s741_s9, 10  ;;  %s578_s22 = sshll.u32 %s87_s20, 6 }
  0x13   : > { %s826_s25 = scalar_lea.hbm %s1020_s0, %s592_s21  ;;  %s91_s26 = scalar_lea.vmem [#allocation3], %s578_s22 }
  0x14   : > { %s99_s27 = sshll.u32 %s91_s26, 4  ;;  %p830_p13 = pnand %p607_p10, %p802_p5  ;;  %s834_s27 = int_to_ptr.vmem [resolvable:$true] %s99_s27 }
  0x15   : > { %s836_s29 = scalar_lea.sflag [#allocation4], %s87_s20  ;;  %s649_s30 = scalar_lea.hbm %s826_s25, 1024 }
  0x16   : > { %p650_p0 = scmp.ne.s32.totalorder %s826_s25, %s649_s30  ;;  %p651_p1 = pneg %p830_p13 }
  0x17   : > { %s654_s4 = scalar_lea.hbm %s1020_s0, 2048  ;;  %p655_p4 = scmp.lt.s32.totalorder %s826_s25, %s1020_s0 }
  0x18   : > { %p652_p2 = pnand %p651_p1, %p650_p0  ;;  %p656_p5 = scmp.lt.s32.totalorder %s654_s4, %s649_s30 }
  0x1a   : > { %p653_p3 = pneg %p652_p2  ;;  %p657_p7 = por %p656_p5, %p655_p4 }
  0x1c   : > { %p658_p8 = pnand %p657_p7, %p653_p3 }
  0x1e   : > { %661 = shalt.err (!%p658_p8)
}
  0x1f   : > { %s662_s13 = scalar_lea.vmem %s834_s27, 1024  ;;  %s743_s14 = smov [#allocation3]  }
  0x20   : > { %p663_p10 = scmp.ne.s32.totalorder %s834_s27, %s662_s13  ;;  %s667_s16 = sshll.u32 %s743_s14, 4  ;;  %s668_s16 = int_to_ptr.vmem [resolvable:$false] %s667_s16 }
  0x21   : > { %s669_s20 = scalar_lea.vmem %s668_s16, 2048  ;;  %p670_p2 = scmp.lt.s32.totalorder %s834_s27, %s668_s16 }
  0x22   : > { %p665_p9 = pnand %p663_p10, %p651_p1  ;;  %p671_p12 = scmp.lt.s32.totalorder %s669_s20, %s662_s13 }
  0x24   : > { %p666_p0 = pneg %p665_p9  ;;  %p672_p11 = por %p671_p12, %p670_p2 }
  0x26   : > { %p673_p6 = pnand %p672_p11, %p666_p0 }
  0x28   : > { %676 = shalt.err (!%p673_p6)
}
  0x29   : > { %s744_s21 = smov 128   ;;  %s745_s22 = smov 8  }
  0x2a   : > { %602 = dma.hbm_to_vmem [thread:$0]  (!%p830_p13), %s826_s25, 1024, %s834_s27, %s836_s29, %s744_s21, %s744_s21, %s745_s22  }
  0x2b   : > { %p582_p9 = scmp.ge.s32.totalorder %s741_s9, 1  ;;  %p107_p1 = scmp.lt.s32.totalorder %s741_s9, 3 }
  0x2d   : > { %p108_p3 = pnand %p582_p9, %p107_p1 }
  0x2e   : > { %s860_s23 = sand.u32 (!%p108_p3), 1, %s733_s7   ;;  %p1029_p6 = scmp.ne.s32.totalorder (!%p108_p3), %s1025_s17, 0 }
  0x2f   : > { %111 = sbr.rel (%p108_p3) target bundleno = 365 (0x16d), region = 24  ;;  %s583_s24 = sshll.u32 (!%p108_p3), %s860_s23, 6 }
  0x30   : > { %s114_s26 = scalar_lea.sflag (!%p108_p3), [#allocation4], %s860_s23  ;;  %s866_s30 = scalar_lea.vmem (!%p108_p3), [#allocation3], %s583_s24 }
  0x34   : > { %720 = dma.done.wait (%p1029_p6), %s114_s26, 1024  }
  0x35   : > { %722 = vsyncadd (%p1029_p6), %s114_s26, 4294966272  ;;  %vm138_vm0 = vcmask 139264   ;;  %vm147_vm1 = vcmask 7168   ;;  %vm161_vm2 = vcmask 146568   ;;  %v746_v0 = vmov 0.0   ;;  %v175_v1 = vld [vmem:[%s866_s30] sm:$0xff] }
  0x36   : > { %139 = vst.msk [vmem:[#allocation2] sm:$0x1] %vm138_vm0, %v746_v0  ;;  %140 = vst.msk [vmem:[#allocation2 + $0x18] sm:$0x1] %vm138_vm0, %v746_v0  ;;  %vm150_vm3 = vcmask 1024   ;;  %vm164_vm4 = vcmask 140424  }
  0x37   : > { %149 = vst.msk [vmem:[#allocation2 + $0x8] sm:$0xff] %vm147_vm1, %v746_v0  ;;  %153 = vst.msk [vmem:[#allocation2 + $0x20] sm:$0xff] %vm147_vm1, %v746_v0  ;;  %v177_v2 = vld [vmem:[%s866_s30 + $0x10] sm:$0xff]  ;;  %s747_s17 = smov 1   ;;  %v176_v3 = vld [vmem:[%s866_s30 + $0x8] sm:$0xff]  ;;  %vm215_vm5 = vcmask 138248  }
  0x38   : > { %141 = vst.msk [vmem:[#allocation2 + $0x30] sm:$0x1] %vm138_vm0, %v746_v0  ;;  %142 = vst.msk [vmem:[#allocation2 + $0x48] sm:$0x1] %vm138_vm0, %v746_v0  ;;  %191 = vrot.lane.b32.xlu0 %v175_v1, %s747_s17  ;;  %195 = vrot.lane.b32.xlu1 %v177_v2, %s747_s17  ;;  %v178_v4 = vld [vmem:[%s866_s30 + $0x18] sm:$0xff]  ;;  %v179_v5 = vld [vmem:[%s866_s30 + $0x20] sm:$0xff] }
  0x39   : > { %143 = vst.msk [vmem:[#allocation2 + $0x11] sm:$0x1] %vm138_vm0, %v746_v0  ;;  %144 = vst.msk [vmem:[#allocation2 + $0x29] sm:$0x1] %vm138_vm0, %v746_v0  ;;  %v180_v6 = vld [vmem:[%s866_s30 + $0x28] sm:$0xff]  ;;  %v182_v7 = vld [vmem:[%s866_s30 + $0x38] sm:$0xff] }
  0x3a   : > { %145 = vst.msk [vmem:[#allocation2 + $0x41] sm:$0x1] %vm138_vm0, %v746_v0  ;;  %146 = vst.msk [vmem:[#allocation2 + $0x59] sm:$0x1] %vm138_vm0, %v746_v0  ;;  %v181_v8 = vld [vmem:[%s866_s30 + $0x30] sm:$0xff]  ;;  %s748_s25 = smov 127  }
  0x3b   : > { %156 = vst.msk [vmem:[#allocation2 + $0x38] sm:$0xff] %vm147_vm1, %v746_v0  ;;  %159 = vst.msk [vmem:[#allocation2 + $0x50] sm:$0xff] %vm147_vm1, %v746_v0  ;;  %s749_s27 = smov 126   ;;  %vm388_vm6 = vcmask 1046528   ;;  %vm441_vm7 = vcmask 1045504   ;;  %vm478_vm8 = vcmask 130048  }
  0x3c   : > { %148 = vst.msk [vmem:[#allocation2] sm:$0xff] %vm147_vm1, %v746_v0  ;;  %152 = vst.msk [vmem:[#allocation2 + $0x18] sm:$0xff] %vm147_vm1, %v746_v0  ;;  %193 = vrot.lane.b32.xlu0 %v176_v3, %s747_s17  ;;  %197 = vrot.lane.b32.xlu1 %v178_v4, %s747_s17  ;;  %s934_s28 = scalar_lea.vmem [#allocation6], %s583_s24  ;;  %s594_s29 = sshll.u32 %s784_s10, 10 }
  0x3d   : > { %163 = vst.msk [vmem:[#allocation2 + $0x8] sm:$0xff] %vm161_vm2, %v746_v0  ;;  %167 = vst.msk [vmem:[#allocation2 + $0x20] sm:$0xff] %vm161_vm2, %v746_v0  ;;  %s502_s2 = sshll.u32 %s934_s28, 4  ;;  %s973_s5 = scalar_lea.hbm %s1021_s1, %s594_s29  ;;  %s975_s2 = int_to_ptr.vmem [resolvable:$true] %s502_s2 }
  0x3e   : > { %155 = vst.msk [vmem:[#allocation2 + $0x30] sm:$0xff] %vm147_vm1, %v746_v0  ;;  %158 = vst.msk [vmem:[#allocation2 + $0x48] sm:$0xff] %vm147_vm1, %v746_v0  ;;  %s488_s10 = scalar_lea.sflag [#allocation5], %s860_s23  ;;  %s677_s11 = scalar_lea.vmem %s975_s2, 1024 }
  0x3f   : > { %170 = vst.msk [vmem:[#allocation2 + $0x38] sm:$0xff] %vm161_vm2, %v746_v0  ;;  %173 = vst.msk [vmem:[#allocation2 + $0x50] sm:$0xff] %vm161_vm2, %v746_v0  ;;  %p678_p11 = scmp.ne.s32.totalorder %s975_s2, %s677_s11  ;;  %p1030_p12 = scmp.ne.s32.totalorder %s1026_s18, 0 }
  0x40   : > { %151 = vst.msk [vmem:[#allocation2 + $0x10] sm:$0x3] %vm150_vm3, %v746_v0  ;;  %154 = vst.msk [vmem:[#allocation2 + $0x28] sm:$0x3] %vm150_vm3, %v746_v0  ;;  %199 = vrot.lane.b32.xlu0 %v179_v5, %s747_s17  ;;  %201 = vrot.lane.b32.xlu1 %v180_v6, %s747_s17  ;;  %s750_s13 = smov [#allocation6]  }
  0x41   : > { %157 = vst.msk [vmem:[#allocation2 + $0x40] sm:$0x3] %vm150_vm3, %v746_v0  ;;  %160 = vst.msk [vmem:[#allocation2 + $0x58] sm:$0x3] %vm150_vm3, %v746_v0  ;;  %p679_p13 = pnand %p678_p11, %p1030_p12  ;;  %s681_s14 = sshll.u32 %s750_s13, 4  ;;  %s682_s14 = int_to_ptr.vmem [resolvable:$false] %s681_s14 }
  0x42   : > { %162 = vst.msk [vmem:[#allocation2] sm:$0xff] %vm161_vm2, %v746_v0  ;;  %166 = vst.msk [vmem:[#allocation2 + $0x18] sm:$0xff] %vm161_vm2, %v746_v0  ;;  %s683_s16 = scalar_lea.vmem %s682_s14, 2048  ;;  %p684_p5 = scmp.lt.s32.totalorder %s975_s2, %s682_s14 }
  0x43   : > { %165 = vst.msk [vmem:[#allocation2 + $0x10] sm:$0x3] %vm164_vm4, %v746_v0  ;;  %168 = vst.msk [vmem:[#allocation2 + $0x28] sm:$0x3] %vm164_vm4, %v746_v0  ;;  %p680_p4 = pneg %p679_p13  ;;  %p685_p7 = scmp.lt.s32.totalorder %s683_s16, %s677_s11 }
  0x44   : > { %169 = vst.msk [vmem:[#allocation2 + $0x30] sm:$0xff] %vm161_vm2, %v746_v0  ;;  %172 = vst.msk [vmem:[#allocation2 + $0x48] sm:$0xff] %vm161_vm2, %v746_v0  ;;  %205 = vrot.lane.b32.xlu1 %v182_v7, %s747_s17  ;;  %203 = vrot.lane.b32.xlu0 %v181_v8, %s747_s17 }
  0x45   : > { %171 = vst.msk [vmem:[#allocation2 + $0x40] sm:$0x3] %vm164_vm4, %v746_v0  ;;  %174 = vst.msk [vmem:[#allocation2 + $0x58] sm:$0x3] %vm164_vm4, %v746_v0  ;;  %p686_p8 = por %p685_p7, %p684_p5 }
  0x47   : > { %p687_p10 = pnand %p686_p8, %p680_p4 }
  0xaa   : > { %v192_v9 = vpop.permute.xlu0 %191  ;;  %v196_v10 = vpop.permute.xlu1 %195 }
  0xab   : > { %216 = vst.msk [vmem:[#allocation2 + $0x1] sm:$0xff] %vm215_vm5, %v192_v9  ;;  %218 = vst.msk [vmem:[#allocation2 + $0x19] sm:$0xff] %vm215_vm5, %v196_v10 }
  0xae   : > { %v194_v11 = vpop.permute.xlu0 %193  ;;  %v198_v12 = vpop.permute.xlu1 %197 }
  0xaf   : > { %217 = vst.msk [vmem:[#allocation2 + $0x9] sm:$0xff] %vm215_vm5, %v194_v11  ;;  %219 = vst.msk [vmem:[#allocation2 + $0x21] sm:$0xff] %vm215_vm5, %v198_v12 }
  0xb2   : > { %v224_v13 = vld [vmem:[#allocation2] sm:$0xff]  ;;  %v200_v14 = vpop.permute.xlu0 %199  ;;  %v202_v15 = vpop.permute.xlu1 %201  ;;  %v227_v20 = vld [vmem:[#allocation2 + $0x18] sm:$0xff] }
  0xb3   : > { %260 = vrot.lane.b32.xlu0 %v224_v13, %s748_s25  ;;  %220 = vst.msk [vmem:[#allocation2 + $0x31] sm:$0xff] %vm215_vm5, %v200_v14  ;;  %221 = vst.msk [vmem:[#allocation2 + $0x39] sm:$0xff] %vm215_vm5, %v202_v15  ;;  %v236_v29 = vmul.f32 0.60653067, %v224_v13  ;;  %v239_v32 = vmul.f32 0.60653067, %v227_v20 }
  0xb6   : > { %v225_v16 = vld [vmem:[#allocation2 + $0x8] sm:$0xff]  ;;  %v226_v17 = vld [vmem:[#allocation2 + $0x10] sm:$0x3]  ;;  %v206_v18 = vpop.permute.xlu1 %205  ;;  %v204_v19 = vpop.permute.xlu0 %203  ;;  %v228_v21 = vld [vmem:[#allocation2 + $0x20] sm:$0xff] }
  0xb7   : > { %262 = vrot.lane.b32.xlu1 %v225_v16, %s748_s25  ;;  %264 = vrot.lane.b32.xlu0 %v226_v17, %s748_s25  ;;  %223 = vst.msk [vmem:[#allocation2 + $0x51] sm:$0xff] %vm215_vm5, %v206_v18  ;;  %222 = vst.msk [vmem:[#allocation2 + $0x49] sm:$0xff] %vm215_vm5, %v204_v19  ;;  %v229_v22 = vld [vmem:[#allocation2 + $0x28] sm:$0x3]  ;;  %v237_v30 = vmul.f32 0.60653067, %v225_v16 }
  0xb8   : > { %v238_v31 = vmul.f32 0.60653067, %v226_v17  ;;  %v240_v33 = vmul.f32 0.60653067, %v228_v21  ;;  %v241_v34 = vmul.f32 0.60653067, %v229_v22 }
  0xba   : > { %v230_v23 = vld [vmem:[#allocation2 + $0x30] sm:$0xff]  ;;  %v231_v24 = vld [vmem:[#allocation2 + $0x38] sm:$0xff]  ;;  %v232_v25 = vld [vmem:[#allocation2 + $0x40] sm:$0x3] }
  0xbb   : > { %266 = vrot.lane.b32.xlu1 %v227_v20, %s748_s25  ;;  %268 = vrot.lane.b32.xlu0 %v228_v21, %s748_s25  ;;  %v242_v35 = vmul.f32 0.60653067, %v230_v23  ;;  %v908_v36 = vmul.f32 0.60653067, %v231_v24  ;;  %v910_v37 = vmul.f32 0.60653067, %v232_v25 }
  0xbe   : > { %v233_v26 = vld [vmem:[#allocation2 + $0x48] sm:$0xff]  ;;  %v234_v27 = vld [vmem:[#allocation2 + $0x50] sm:$0xff]  ;;  %v235_v28 = vld [vmem:[#allocation2 + $0x58] sm:$0x3] }
  0xbf   : > { %270 = vrot.lane.b32.xlu1 %v229_v22, %s748_s25  ;;  %272 = vrot.lane.b32.xlu0 %v230_v23, %s748_s25  ;;  %v914_v38 = vmul.f32 0.60653067, %v233_v26  ;;  %v916_v39 = vmul.f32 0.60653067, %v234_v27  ;;  %v920_v40 = vmul.f32 0.60653067, %v235_v28 }
  0xc3   : > { %274 = vrot.lane.b32.xlu1 %v231_v24, %s748_s25  ;;  %276 = vrot.lane.b32.xlu0 %v232_v25, %s748_s25 }
  0xc7   : > { %278 = vrot.lane.b32.xlu1 %v233_v26, %s748_s25  ;;  %280 = vrot.lane.b32.xlu0 %v234_v27, %s748_s25 }
  0xcb   : > { %282 = vrot.lane.b32.xlu1 %v235_v28, %s748_s25  ;;  %320 = vrot.lane.b32.xlu0 %v236_v29, %s749_s27 }
  0xcf   : > { %322 = vrot.lane.b32.xlu1 %v237_v30, %s749_s27  ;;  %324 = vrot.lane.b32.xlu0 %v238_v31, %s749_s27 }
  0xd3   : > { %326 = vrot.lane.b32.xlu1 %v239_v32, %s749_s27  ;;  %328 = vrot.lane.b32.xlu0 %v240_v33, %s749_s27 }
  0xd7   : > { %330 = vrot.lane.b32.xlu1 %v241_v34, %s749_s27  ;;  %332 = vrot.lane.b32.xlu0 %v242_v35, %s749_s27 }
  0xdb   : > { %334 = vrot.lane.b32.xlu1 %v908_v36, %s749_s27  ;;  %336 = vrot.lane.b32.xlu0 %v910_v37, %s749_s27 }
  0xdf   : > { %338 = vrot.lane.b32.xlu1 %v914_v38, %s749_s27  ;;  %340 = vrot.lane.b32.xlu0 %v916_v39, %s749_s27 }
  0xe3   : > { %342 = vrot.lane.b32.xlu1 %v920_v40, %s749_s27 }
 0x125   : > { %v261_v41 = vpop.permute.xlu0 %260 }
 0x126   : > { %v296_v52 = vadd.f32 %v261_v41, %v236_v29 }
 0x129   : > { %v263_v42 = vpop.permute.xlu1 %262  ;;  %v265_v43 = vpop.permute.xlu0 %264 }
 0x12a   : > { %v297_v56 = vadd.f32 %v263_v42, %v237_v30  ;;  %v298_v57 = vadd.f32 %v265_v43, %v238_v31 }
 0x12d   : > { %v267_v44 = vpop.permute.xlu1 %266  ;;  %v269_v45 = vpop.permute.xlu0 %268 }
 0x12e   : > { %v299_v4 = vadd.f32 %v267_v44, %v239_v32  ;;  %v300_v5 = vadd.f32 %v269_v45, %v240_v33 }
 0x131   : > { %v271_v46 = vpop.permute.xlu1 %270  ;;  %v273_v47 = vpop.permute.xlu0 %272 }
 0x132   : > { %v301_v17 = vadd.f32 %v271_v46, %v241_v34  ;;  %v302_v18 = vadd.f32 %v273_v47, %v242_v35 }
 0x135   : > { %v275_v48 = vpop.permute.xlu1 %274  ;;  %v277_v49 = vpop.permute.xlu0 %276 }
 0x136   : > { %v303_v31 = vadd.f32 %v275_v48, %v908_v36  ;;  %v304_v42 = vadd.f32 %v277_v49, %v910_v37 }
 0x139   : > { %v279_v50 = vpop.permute.xlu1 %278  ;;  %v923_v51 = vpop.permute.xlu0 %280 }
 0x13a   : > { %v305_v43 = vadd.f32 %v279_v50, %v914_v38 }
 0x13d   : > { %v925_v53 = vpop.permute.xlu1 %282  ;;  %v321_v54 = vpop.permute.xlu0 %320 }
 0x13e   : > { %v356_v55 = vadd.f32 %v321_v54, %v296_v52 }
 0x140   : > { %v368_v58 = vmul.f32 0.60653067, %v356_v55  ;;  %v389_v63 = vrot.slane %v356_v55, 1  ;;  %v306_v55 = vadd.f32 %v923_v51, %v916_v39 }
 0x141   : > { %v323_v59 = vpop.permute.xlu1 %322  ;;  %v325_v60 = vpop.permute.xlu0 %324 }
 0x142   : > { %v357_v61 = vadd.f32 %v323_v59, %v297_v56  ;;  %v358_v62 = vadd.f32 %v325_v60, %v298_v57  ;;  %v442_v6 = vrot.slane %v368_v58, 2 }
 0x144   : > { %v369_v0 = vmul.f32 0.60653067, %v357_v61  ;;  %v390_v1 = vrot.slane %v357_v61, 1  ;;  %v392_v2 = vrot.slane %v358_v62, 1  ;;  %v425_v3 = vmul.f32 0.60653067, %v358_v62 }
 0x145   : > { %v327_v7 = vpop.permute.xlu1 %326  ;;  %v329_v8 = vpop.permute.xlu0 %328 }
 0x146   : > { %v391_v9 = vsel %vm388_vm6, %v389_v63, %v390_v1  ;;  %v443_v10 = vrot.slane %v369_v0, 2  ;;  %v393_v11 = vsel %vm388_vm6, %v390_v1, %v392_v2  ;;  %v445_v12 = vrot.slane %v425_v3, 2 }
 0x147   : > { %v417_v13 = vadd.f32 %v391_v9, %v368_v58  ;;  %v418_v14 = vadd.f32 %v393_v11, %v369_v0  ;;  %v359_v15 = vadd.f32 %v327_v7, %v299_v4  ;;  %v360_v16 = vadd.f32 %v329_v8, %v300_v5 }
 0x148   : > { %v444_v19 = vsel %vm441_vm7, %v442_v6, %v443_v10  ;;  %v446_v20 = vsel %vm441_vm7, %v443_v10, %v445_v12  ;;  %v307_v3 = vadd.f32 %v925_v53, %v920_v40 }
 0x149   : > { %v470_v21 = vadd.f32 %v444_v19, %v417_v13  ;;  %v471_v22 = vadd.f32 %v446_v20, %v418_v14  ;;  %v370_v23 = vmul.f32 0.60653067, %v359_v15  ;;  %v394_v24 = vrot.slane %v359_v15, 1  ;;  %v331_v25 = vpop.permute.xlu1 %330  ;;  %v333_v26 = vpop.permute.xlu0 %332 }
 0x14a   : > { %v371_v27 = vmul.f32 0.60653067, %v360_v16  ;;  %v395_v28 = vrot.slane %v360_v16, 1  ;;  %v361_v29 = vadd.f32 %v331_v25, %v301_v17  ;;  %v362_v30 = vadd.f32 %v333_v26, %v302_v18 }
 0x14b   : > { %479 = vst.msk [vmem:[%s934_s28] sm:$0xff] %vm478_vm8, %v470_v21  ;;  %480 = vst.msk [vmem:[%s934_s28 + $0x8] sm:$0xff] %vm478_vm8, %v471_v22  ;;  %v447_v32 = vrot.slane %v370_v23, 2 }
 0x14c   : > { %v396_v33 = vsel %vm388_vm6, %v394_v24, %v395_v28  ;;  %v448_v34 = vrot.slane %v371_v27, 2  ;;  %v397_v35 = vrot.slane %v361_v29, 1  ;;  %v426_v41 = vmul.f32 0.60653067, %v361_v29 }
 0x14d   : > { %v419_v36 = vadd.f32 %v396_v33, %v370_v23  ;;  %v372_v44 = vmul.f32 0.60653067, %v362_v30  ;;  %v335_v45 = vpop.permute.xlu1 %334  ;;  %v337_v46 = vpop.permute.xlu0 %336  ;;  %v399_v38 = vrot.slane %v362_v30, 1 }
 0x14e   : > { %v449_v47 = vsel %vm441_vm7, %v447_v32, %v448_v34  ;;  %v398_v48 = vsel %vm388_vm6, %v395_v28, %v397_v35  ;;  %v450_v52 = vrot.slane %v426_v41, 2  ;;  %v363_v54 = vadd.f32 %v335_v45, %v303_v31 }
 0x14f   : > { %v472_v56 = vadd.f32 %v449_v47, %v419_v36  ;;  %v420_v57 = vadd.f32 %v398_v48, %v371_v27  ;;  %v364_v58 = vadd.f32 %v337_v46, %v304_v42  ;;  %v452_v60 = vrot.slane %v372_v44, 2 }
 0x150   : > { %v451_v37 = vsel %vm441_vm7, %v448_v34, %v450_v52  ;;  %v373_v49 = vmul.f32 0.60653067, %v363_v54  ;;  %v400_v50 = vrot.slane %v363_v54, 1 }
 0x151   : > { %481 = vst.msk [vmem:[%s934_s28 + $0x10] sm:$0xff] %vm478_vm8, %v472_v56  ;;  %v473_v59 = vadd.f32 %v451_v37, %v420_v57  ;;  %v402_v61 = vrot.slane %v364_v58, 1  ;;  %v427_v62 = vmul.f32 0.60653067, %v364_v58  ;;  %v339_v63 = vpop.permute.xlu1 %338  ;;  %v341_v0 = vpop.permute.xlu0 %340 }
 0x152   : > { %v401_v1 = vsel %vm388_vm6, %v399_v38, %v400_v50  ;;  %v453_v39 = vrot.slane %v373_v49, 2  ;;  %v365_v51 = vadd.f32 %v339_v63, %v305_v43  ;;  %v366_v2 = vadd.f32 %v341_v0, %v306_v55 }
 0x153   : > { %482 = vst.msk [vmem:[%s934_s28 + $0x18] sm:$0xff] %vm478_vm8, %v473_v59  ;;  %v421_v4 = vadd.f32 %v401_v1, %v372_v44  ;;  %v403_v5 = vsel %vm388_vm6, %v400_v50, %v402_v61  ;;  %v455_v6 = vrot.slane %v427_v62, 2 }
 0x154   : > { %v454_v7 = vsel %vm441_vm7, %v452_v60, %v453_v39  ;;  %v422_v8 = vadd.f32 %v403_v5, %v373_v49  ;;  %v374_v9 = vmul.f32 0.60653067, %v365_v51  ;;  %v404_v10 = vrot.slane %v365_v51, 1 }
 0x155   : > { %v474_v11 = vadd.f32 %v454_v7, %v421_v4  ;;  %v456_v12 = vsel %vm441_vm7, %v453_v39, %v455_v6  ;;  %v375_v13 = vmul.f32 0.60653067, %v366_v2  ;;  %v405_v40 = vrot.slane %v366_v2, 1  ;;  %v343_v53 = vpop.permute.xlu1 %342 }
 0x156   : > { %v475_v14 = vadd.f32 %v456_v12, %v422_v8  ;;  %v457_v15 = vrot.slane %v374_v9, 2  ;;  %v367_v16 = vadd.f32 %v343_v53, %v307_v3 }
 0x157   : > { %483 = vst.msk [vmem:[%s934_s28 + $0x20] sm:$0xff] %vm478_vm8, %v474_v11  ;;  %v406_v17 = vsel %vm388_vm6, %v404_v10, %v405_v40  ;;  %v458_v18 = vrot.slane %v375_v13, 2 }
 0x158   : > { %484 = vst.msk [vmem:[%s934_s28 + $0x28] sm:$0xff] %vm478_vm8, %v475_v14  ;;  %v423_v19 = vadd.f32 %v406_v17, %v374_v9  ;;  %v407_v20 = vrot.slane %v367_v16, 1  ;;  %v428_v21 = vmul.f32 0.60653067, %v367_v16 }
 0x159   : > { %v459_v22 = vsel %vm441_vm7, %v457_v15, %v458_v18 }
 0x15a   : > { %v476_v23 = vadd.f32 %v459_v22, %v423_v19  ;;  %v408_v24 = vsel %vm388_vm6, %v405_v40, %v407_v20  ;;  %v460_v25 = vrot.slane %v428_v21, 2 }
 0x15b   : > { %v424_v26 = vadd.f32 %v408_v24, %v375_v13 }
 0x15c   : > { %485 = vst.msk [vmem:[%s934_s28 + $0x30] sm:$0xff] %vm478_vm8, %v476_v23  ;;  %v461_v27 = vsel %vm441_vm7, %v458_v18, %v460_v25 }
 0x15d   : > { %v477_v28 = vadd.f32 %v461_v27, %v424_v26 }
 0x15f   : > { %486 = vst.msk [vmem:[%s934_s28 + $0x38] sm:$0xff] %vm478_vm8, %v477_v28 }
 0x160   : > { %690 = shalt.err (!%p687_p10)
}
 0x161   : > { %s691_s20 = scalar_lea.hbm %s973_s5, 1024  ;;  %s695_s24 = scalar_lea.hbm %s1021_s1, 2048 }
 0x162   : > { %p692_p0 = scmp.ne.s32.totalorder %s973_s5, %s691_s20  ;;  %p696_p1 = scmp.lt.s32.totalorder %s973_s5, %s1021_s1 }
 0x163   : > { %p697_p3 = scmp.lt.s32.totalorder %s695_s24, %s691_s20 }
 0x164   : > { %p693_p2 = pnand %p692_p0, %p1030_p12 }
 0x165   : > { %p698_p6 = por %p697_p3, %p696_p1 }
 0x166   : > { %p694_p9 = pneg %p693_p2 }
 0x168   : > { %p699_p11 = pnand %p698_p6, %p694_p9 }
 0x16a   : > { %702 = shalt.err (!%p699_p11)
}
 0x16b   : > { %s751_s17 = smov 128   ;;  %s752_s25 = smov 8  }
 0x16c   : > { %597 = dma.vmem_to_hbm [thread:$0]  (%p1030_p12), %s975_s2, 1024, %s973_s5, %s488_s10, %s751_s17, %s751_s17, %s752_s25  }
 0x16d PF: > { %s517_s27 = sand.u32 1, %s729_s6   ;;  %p1031_p13 = scmp.ne.s32.totalorder %s1027_s19, 0 }
 0x16e   : > { %p1032_p4 = scmp.ge.s32.totalorder %s741_s9, 2  ;;  %s518_s28 = scalar_lea.sflag [#allocation5], %s517_s27 }
 0x170   : > { %p604_p5 = pnand %p1032_p4, %p1031_p13 }
 0x172   : > { %p605_p7 = pneg %p604_p5 }
 0x174   : > { %724 = dma.done.wait (%p605_p7), %s518_s28, 1024  }
 0x175   : > { %726 = vsyncadd (%p605_p7), %s518_s28, 4294966272  ;;  %p14_p8 = scmp.ge.s32.totalorder %s788_s12, 4   ;;  %s1033_s6 = smov %s733_s7 }
 0x176   : > { %s1034_s7 = smov %s737_s8  ;;  %s1035_s8 = smov %s800_s15 }
 0x177   : > { %s1036_s9 = smov %s788_s12  ;;  %16 = sbr.rel (!%p14_p8) target bundleno = 5 (0x5), region = 69 }
 0x17c   :  { %523 = vsyncpa [#allocation4], 1 }
 0x17d   :  { %525 = vsyncpa [#allocation4 + $0x1], 1 }
 0x17e   :  { %526 = vsyncpa [#allocation5], 1 }
 0x17f   :  { %528 = vsyncpa [#allocation5 + $0x1], 1 }

</bundles_post_ra>
